<compile_context>
chip_gen: v5e
topology: v5e:2x2
jax: 0.10.0
libtpu: 0.0.40
codegen_flags: <defaults>
</compile_context>

<pallas_src>
import functools

import jax
import jax.numpy as jnp
from jax.experimental import pallas as pl
from jax.experimental.pallas import tpu as pltpu


# ----------------------------- Pallas kernel ------------------------------

def conv1x1_kernel(x_ref, w_ref, b_ref, o_ref):
    # x: (TM, Kp) bf16, w: (Kp, Np) bf16, b: (1, Np) f32 -> o: (TM, Np) f32
    acc = jnp.dot(x_ref[...], w_ref[...], preferred_element_type=jnp.float32)
    o_ref[...] = acc + b_ref[...]


# ----------------------------- wrapper -------------------------------------

def _round_up(x, m):
    return (x + m - 1) // m * m


@functools.partial(jax.jit, static_argnames=("padding",))
def outconv_forward(x_nchw, weight, bias, padding=1):
    """PyTorch-equivalent forward of `outconv`.

    x_nchw: (N, Cin, H, W) f32
    weight: (Cout, Cin, 1, 1) f32   (torch Conv2d layout)
    bias:   (Cout,) f32
    returns (N, Cout, H + 2*padding, W + 2*padding) f32
    """
    N, Cin, H, W = x_nchw.shape
    Cout = weight.shape[0]

    # NCHW -> NHWC, then zero-pad spatially (k=1, stride=1, pad=1 => border = bias).
    x = jnp.transpose(x_nchw, (0, 2, 3, 1))
    xp = jnp.pad(x, ((0, 0), (padding, padding), (padding, padding), (0, 0)))
    Ho, Wo = H + 2 * padding, W + 2 * padding

    # Flatten pixels -> rows of a matmul.
    M = N * Ho * Wo
    Kp = _round_up(max(Cin, 128), 128)      # lane-dense K
    Np = _round_up(max(Cout, 128), 128)     # lane-dense N (unmasked stores)
    TM = min(512, _round_up(M, 8))          # row tile (multiple of 8 sublanes)
    Mp = _round_up(M, TM)

    # Operands: bf16 for the MXU, zero-padded to the lane-dense shapes.
    x2d = xp.reshape(M, Cin)
    x2d = jnp.pad(x2d, ((0, Mp - M), (0, Kp - Cin))).astype(jnp.bfloat16)
    w2d = jnp.transpose(weight.reshape(Cout, Cin), (1, 0))          # (Cin, Cout)
    w2d = jnp.pad(w2d, ((0, Kp - Cin), (0, Np - Cout))).astype(jnp.bfloat16)
    b2d = jnp.pad(bias.reshape(1, Cout), ((0, 0), (0, Np - Cout))).astype(jnp.float32)

    grid = (pl.cdiv(Mp, TM),)

    # VMEM budget: double-buffered activation/output tiles + resident weight/bias.
    vmem_need = (2 * TM * Kp * 2      # x tiles (bf16, double-buffered)
                 + Kp * Np * 2        # resident weights (bf16)
                 + Np * 4             # resident bias (f32)
                 + 2 * TM * Np * 4)   # output tiles (f32, double-buffered)
    vmem_limit = int(min(max(2 * vmem_need, 4 << 20), 32 << 20))

    cost = pl.CostEstimate(
        flops=2 * Mp * Kp * Np,
        transcendentals=0,
        bytes_accessed=x2d.size * 2 + w2d.size * 2 + b2d.size * 4 + Mp * Np * 4,
    )

    out = pl.pallas_call(
        conv1x1_kernel,
        out_shape=jax.ShapeDtypeStruct((Mp, Np), jnp.float32),
        grid=grid,
        in_specs=[
            pl.BlockSpec((TM, Kp), lambda i: (i, 0)),   # streaming activation rows
            pl.BlockSpec((Kp, Np), lambda i: (0, 0)),   # resident weights
            pl.BlockSpec((1, Np), lambda i: (0, 0)),    # resident bias
        ],
        out_specs=pl.BlockSpec((TM, Np), lambda i: (i, 0)),
        compiler_params=pltpu.CompilerParams(
            dimension_semantics=("parallel",),
            vmem_limit_bytes=vmem_limit,
        ),
        cost_estimate=cost,
    )(x2d, w2d, b2d)

    out = out[:M, :Cout].reshape(N, Ho, Wo, Cout)
    return jnp.transpose(out, (0, 3, 1, 2))             # back to NCHW


# ----------------------------- main ----------------------------------------

if __name__ == "__main__":
    key = jax.random.PRNGKey(0)
    kx, kw, kb = jax.random.split(key, 3)

    # Small shapes consistent with the module: outconv(in_ch=4, out_ch=4).
    N, in_ch, H, W = 2, 4, 16, 16
    out_ch, padding = 4, 1

    x = jax.random.normal(kx, (N, in_ch, H, W), jnp.float32)
    weight = 0.1 * jax.random.normal(kw, (out_ch, in_ch, 1, 1), jnp.float32)
    bias = 0.1 * jax.random.normal(kb, (out_ch,), jnp.float32)

    out = outconv_forward(x, weight, bias, padding=padding)
    jax.block_until_ready(out)

    # Shape check: Conv2d(k=1, s=1, p=1) grows spatial dims by 2.
    assert out.shape == (N, out_ch, H + 2 * padding, W + 2 * padding), out.shape

    # Reference (plain JAX, f32) sanity check; bf16 matmul operands -> loose tolerance.
    xpad = jnp.pad(jnp.transpose(x, (0, 2, 3, 1)),
                   ((0, 0), (padding, padding), (padding, padding), (0, 0)))
    ref = jnp.einsum("nhwc,oc->nhwo", xpad, weight.reshape(out_ch, in_ch)) + bias
    ref = jnp.transpose(ref, (0, 3, 1, 2))
    assert jnp.allclose(out, ref, rtol=2e-2, atol=2e-2), float(jnp.max(jnp.abs(out - ref)))

    print("KERNEL_OK")
</pallas_src>

<mosaic_0001>
module attributes {stable_mosaic.version = 11 : i64} {
  func.func @conv1x1_kernel(%arg0: i32, %arg1: memref<512x128xbf16, #tpu.memory_space<vmem>>, %arg2: memref<128x128xbf16, #tpu.memory_space<vmem>>, %arg3: memref<1x128xf32, #tpu.memory_space<vmem>>, %arg4: memref<512x128xf32, #tpu.memory_space<vmem>>) attributes {dimension_semantics = [#tpu.dimension_semantics<parallel>], iteration_bounds = array<i64: 2>, scalar_prefetch = 0 : i64, scratch_operands = 0 : i64, tpu.core_type = #tpu.core_type<tc>, window_params = [{transform_indices = @transform_0, window_bounds = array<i64: 512, 128>}, {pipeline_mode = #tpu.pipeline_mode<synchronous>, transform_indices = @transform_1, window_bounds = array<i64: 128, 128>}, {pipeline_mode = #tpu.pipeline_mode<synchronous>, transform_indices = @transform_2, window_bounds = array<i64: 1, 128>}, {transform_indices = @transform_3, window_bounds = array<i64: 512, 128>}]} {
    %c0 = arith.constant 0 : index
    %c0_0 = arith.constant 0 : index
    %0 = vector.load %arg1[%c0, %c0_0] : memref<512x128xbf16, #tpu.memory_space<vmem>>, vector<512x128xbf16>
    %c0_1 = arith.constant 0 : index
    %c0_2 = arith.constant 0 : index
    %1 = vector.load %arg2[%c0_1, %c0_2] : memref<128x128xbf16, #tpu.memory_space<vmem>>, vector<128x128xbf16>
    %cst = arith.constant dense<0.000000e+00> : vector<512x128xf32>
    %2 = tpu.matmul %0, %1, %cst {dimension_numbers = #tpu.dot_dimension_numbers<[1], [0], [0], [1], [0, 0, 1, 1], [], []>} : vector<512x128xbf16>, vector<128x128xbf16>, vector<512x128xf32> -> vector<512x128xf32>
    %c0_3 = arith.constant 0 : index
    %c0_4 = arith.constant 0 : index
    %3 = vector.load %arg3[%c0_3, %c0_4] : memref<1x128xf32, #tpu.memory_space<vmem>>, vector<1x128xf32>
    %4 = vector.broadcast %3 : vector<1x128xf32> to vector<512x128xf32>
    %5 = arith.addf %2, %4 : vector<512x128xf32>
    %c0_5 = arith.constant 0 : index
    %c0_6 = arith.constant 0 : index
    %6 = vector.load %arg4[%c0_5, %c0_6] : memref<512x128xf32, #tpu.memory_space<vmem>>, vector<512x128xf32>
    tpu.vector_store %arg4[%c0_5, %c0_6], %5 {strides = array<i32>} : memref<512x128xf32, #tpu.memory_space<vmem>>, vector<512x128xf32>,
    return
  }
  func.func @transform_0(%arg0: i32) -> (i32, i32) {
    %c0_i32 = arith.constant 0 : i32
    %c0_i32_0 = arith.constant 0 : i32
    return %arg0, %c0_i32 : i32, i32
  }
  func.func @transform_1(%arg0: i32) -> (i32, i32) {
    %c0_i32 = arith.constant 0 : i32
    %c0_i32_0 = arith.constant 0 : i32
    %c0_i32_1 = arith.constant 0 : i32
    return %c0_i32, %c0_i32_0 : i32, i32
  }
  func.func @transform_2(%arg0: i32) -> (i32, i32) {
    %c0_i32 = arith.constant 0 : i32
    %c0_i32_0 = arith.constant 0 : i32
    %c0_i32_1 = arith.constant 0 : i32
    return %c0_i32, %c0_i32_0 : i32, i32
  }
  func.func @transform_3(%arg0: i32) -> (i32, i32) {
    %c0_i32 = arith.constant 0 : i32
    %c0_i32_0 = arith.constant 0 : i32
    return %arg0, %c0_i32 : i32, i32
  }
}

</mosaic_0001>

<bundles_post_ra>
// kernel: outconv_forward.1
= control target key start
LH: loop header
LB: loop body
LE: loop exit
PB: predicated region body
PF: predicated region fallthrough
CT: control target
= control target key end

     0   :  { %s1059_s12 = smov 0   ;;  %s1273_s0 = inlined_call_operand.vmem [shape: bf16[1024,128], index: 0, kind: input, shape index: {}]   ;;  %s1274_s1 = inlined_call_operand.vmem [shape: bf16[128,128], index: 1, kind: input, shape index: {}]   ;;  %s1275_s2 = inlined_call_operand.vmem [shape: f32[1,128], index: 2, kind: input, shape index: {}]   ;;  %s1276_s3 = inlined_call_operand.vmem [shape: f32[1024,128], index: 3, kind: output, shape index: {}]  }
   0x1 LB: > { %s787_s13 = sadd.s32 4294967295, %s1037_s12   ;;  %p791_p0 = scmp.ge.s32.totalorder %s1037_s12, 1  ;;  %s1037_s12 = sphi %s1059_s12, %s13_s12  }
   0x2   : > { %p138_p1 = scmp.lt.s32.totalorder %s1037_s12, 3 }
   0x4   : > { %p139_p2 = pnand %p791_p0, %p138_p1 }
   0x5   : > { %s792_s22 = sshll.u32 (!%p139_p2), %s787_s13, 6 }
   0x6   : > { %142 = sbr.rel (%p139_p2) target bundleno = 300 (0x12c), region = 32  ;;  %p163_p3 = scmp.lt.s32.totalorder (!%p139_p2), %s792_s22, 127 }
   0xb   : > { %v997_v0 = vld [vmem:[%s1274_s1 + $0x38] sm:$0xff]  ;;  %v996_v1 = vld [vmem:[%s1274_s1 + $0x30] sm:$0xff]  ;;  %v995_v2 = vld [vmem:[%s1274_s1 + $0x28] sm:$0xff]  ;;  %s1278_s22 = smov (!%p163_p3, %s792_s22), 127 }
   0xc   : > { %498 = vmatpush.bf16.msra.mxu0 %v997_v0  ;;  %998 = vmatpush.bf16.msra.mxu1 %v997_v0  ;;  %v994_v3 = vld [vmem:[%s1274_s1 + $0x20] sm:$0xff]  ;;  %v993_v4 = vld [vmem:[%s1274_s1 + $0x18] sm:$0xff]  ;;  %v992_v5 = vld [vmem:[%s1274_s1 + $0x10] sm:$0xff]  ;;  %s793_s29 = sshll.u32 %s1278_s22, 2  ;;  %s795_s8 = sshll.u32 %s1278_s22, 3 }
   0xd   : > { %999 = vmatpush.bf16.msra.mxu2 %v997_v0  ;;  %1000 = vmatpush.bf16.msra.mxu3 %v997_v0  ;;  %v991_v6 = vld [vmem:[%s1274_s1 + $0x8] sm:$0xff]  ;;  %v990_v7 = vld [vmem:[%s1274_s1] sm:$0xff]  ;;  %s1097_s7 = scalar_lea.vmem %s1273_s0, %s793_s29  ;;  %s1140_s14 = scalar_lea.vmem %s1276_s3, %s795_s8 }
   0xe   : > { %v958_v8 = vld [vmem:[%s1097_s7] sm:$0xff]  ;;  %v959_v12 = vld [vmem:[%s1097_s7 + $0x8] sm:$0xff]  ;;  %v960_v16 = vld [vmem:[%s1097_s7 + $0x10] sm:$0xff] }
   0xf   : > { %v966_v9 = vld [vmem:[%s1097_s7 + $0x40] sm:$0xff]  ;;  %v967_v13 = vld [vmem:[%s1097_s7 + $0x48] sm:$0xff]  ;;  %v968_v17 = vld [vmem:[%s1097_s7 + $0x50] sm:$0xff] }
  0x10   : > { %499 = vmatpush.bf16.msra.mxu0 %v996_v1  ;;  %1001 = vmatpush.bf16.msra.mxu1 %v996_v1  ;;  %v974_v10 = vld [vmem:[%s1097_s7 + $0x80] sm:$0xff]  ;;  %v975_v14 = vld [vmem:[%s1097_s7 + $0x88] sm:$0xff]  ;;  %v976_v18 = vld [vmem:[%s1097_s7 + $0x90] sm:$0xff] }
  0x11   : > { %1002 = vmatpush.bf16.msra.mxu2 %v996_v1  ;;  %1003 = vmatpush.bf16.msra.mxu3 %v996_v1  ;;  %v982_v11 = vld [vmem:[%s1097_s7 + $0xc0] sm:$0xff]  ;;  %v983_v15 = vld [vmem:[%s1097_s7 + $0xc8] sm:$0xff]  ;;  %v984_v19 = vld [vmem:[%s1097_s7 + $0xd0] sm:$0xff] }
  0x12   : > { %v961_v20 = vld [vmem:[%s1097_s7 + $0x18] sm:$0xff]  ;;  %v962_v24 = vld [vmem:[%s1097_s7 + $0x20] sm:$0xff]  ;;  %v963_v28 = vld [vmem:[%s1097_s7 + $0x28] sm:$0xff] }
  0x13   : > { %v969_v21 = vld [vmem:[%s1097_s7 + $0x58] sm:$0xff]  ;;  %v970_v25 = vld [vmem:[%s1097_s7 + $0x60] sm:$0xff]  ;;  %v971_v29 = vld [vmem:[%s1097_s7 + $0x68] sm:$0xff] }
  0x14   : > { %500 = vmatpush.bf16.msra.mxu0 %v995_v2  ;;  %1004 = vmatpush.bf16.msra.mxu1 %v995_v2  ;;  %v977_v22 = vld [vmem:[%s1097_s7 + $0x98] sm:$0xff]  ;;  %v978_v26 = vld [vmem:[%s1097_s7 + $0xa0] sm:$0xff]  ;;  %v979_v30 = vld [vmem:[%s1097_s7 + $0xa8] sm:$0xff] }
  0x15   : > { %1005 = vmatpush.bf16.msra.mxu2 %v995_v2  ;;  %1006 = vmatpush.bf16.msra.mxu3 %v995_v2  ;;  %v985_v23 = vld [vmem:[%s1097_s7 + $0xd8] sm:$0xff]  ;;  %v986_v27 = vld [vmem:[%s1097_s7 + $0xe0] sm:$0xff]  ;;  %v987_v31 = vld [vmem:[%s1097_s7 + $0xe8] sm:$0xff] }
  0x16   : > { %v964_v32 = vld [vmem:[%s1097_s7 + $0x30] sm:$0xff]  ;;  %v965_v36 = vld [vmem:[%s1097_s7 + $0x38] sm:$0xff]  ;;  %v1135_v40 = vld [vmem:[%s1275_s2] ss:$0 sm:$0xff] }
  0x17   : > { %v972_v33 = vld [vmem:[%s1097_s7 + $0x70] sm:$0xff]  ;;  %v973_v37 = vld [vmem:[%s1097_s7 + $0x78] sm:$0xff] }
  0x18   : > { %501 = vmatpush.bf16.msra.mxu0 %v994_v3  ;;  %1007 = vmatpush.bf16.msra.mxu1 %v994_v3  ;;  %v980_v34 = vld [vmem:[%s1097_s7 + $0xb0] sm:$0xff]  ;;  %v981_v38 = vld [vmem:[%s1097_s7 + $0xb8] sm:$0xff] }
  0x19   : > { %1008 = vmatpush.bf16.msra.mxu2 %v994_v3  ;;  %1009 = vmatpush.bf16.msra.mxu3 %v994_v3  ;;  %v988_v35 = vld [vmem:[%s1097_s7 + $0xf0] sm:$0xff]  ;;  %v989_v39 = vld [vmem:[%s1097_s7 + $0xf8] sm:$0xff] }
  0x1c   : > { %502 = vmatpush.bf16.msra.mxu0 %v993_v4  ;;  %1010 = vmatpush.bf16.msra.mxu1 %v993_v4 }
  0x1d   : > { %1011 = vmatpush.bf16.msra.mxu2 %v993_v4  ;;  %1012 = vmatpush.bf16.msra.mxu3 %v993_v4 }
  0x20   : > { %503 = vmatpush.bf16.msra.mxu0 %v992_v5  ;;  %1013 = vmatpush.bf16.msra.mxu1 %v992_v5 }
  0x21   : > { %1014 = vmatpush.bf16.msra.mxu2 %v992_v5  ;;  %1015 = vmatpush.bf16.msra.mxu3 %v992_v5 }
  0x24   : > { %504 = vmatpush.bf16.msra.mxu0 %v991_v6  ;;  %1016 = vmatpush.bf16.msra.mxu1 %v991_v6 }
  0x25   : > { %1017 = vmatpush.bf16.msra.mxu2 %v991_v6  ;;  %1018 = vmatpush.bf16.msra.mxu3 %v991_v6 }
  0x28   : > { %505 = vmatpush.bf16.msra.mxu0 %v990_v7  ;;  %1019 = vmatpush.bf16.msra.mxu1 %v990_v7 }
  0x29   : > { %1020 = vmatpush.bf16.msra.mxu2 %v990_v7  ;;  %1021 = vmatpush.bf16.msra.mxu3 %v990_v7 }
  0x2b   : > { %506 = vmatmul.bf16.vlgmr.msra.gmra.mxu0 %v958_v8  ;;  %546 = vmatmul.bf16.vlgmr.msra.gmra.mxu1 %v966_v9 }
  0x2c   : > { %586 = vmatmul.bf16.vlgmr.msra.gmra.mxu2 %v974_v10  ;;  %626 = vmatmul.bf16.vlgmr.msra.gmra.mxu3 %v982_v11 }
  0x3b   : > { %511 = vmatmul.bf16.gmra.mxu0 %v959_v12  ;;  %551 = vmatmul.bf16.gmra.mxu1 %v967_v13 }
  0x3c   : > { %591 = vmatmul.bf16.gmra.mxu2 %v975_v14  ;;  %631 = vmatmul.bf16.gmra.mxu3 %v983_v15 }
  0x4b   : > { %516 = vmatmul.bf16.gmra.mxu0 %v960_v16  ;;  %556 = vmatmul.bf16.gmra.mxu1 %v968_v17 }
  0x4c   : > { %596 = vmatmul.bf16.gmra.mxu2 %v976_v18  ;;  %636 = vmatmul.bf16.gmra.mxu3 %v984_v19 }
  0x5b   : > { %521 = vmatmul.bf16.gmra.mxu0 %v961_v20  ;;  %561 = vmatmul.bf16.gmra.mxu1 %v969_v21 }
  0x5c   : > { %601 = vmatmul.bf16.gmra.mxu2 %v977_v22  ;;  %641 = vmatmul.bf16.gmra.mxu3 %v985_v23 }
  0x6b   : > { %526 = vmatmul.bf16.gmra.mxu0 %v962_v24  ;;  %566 = vmatmul.bf16.gmra.mxu1 %v970_v25 }
  0x6c   : > { %606 = vmatmul.bf16.gmra.mxu2 %v978_v26  ;;  %646 = vmatmul.bf16.gmra.mxu3 %v986_v27 }
  0x7b   : > { %531 = vmatmul.bf16.gmra.mxu0 %v963_v28  ;;  %571 = vmatmul.bf16.gmra.mxu1 %v971_v29 }
  0x7c   : > { %611 = vmatmul.bf16.gmra.mxu2 %v979_v30  ;;  %651 = vmatmul.bf16.gmra.mxu3 %v987_v31 }
  0x8b   : > { %536 = vmatmul.bf16.gmra.mxu0 %v964_v32  ;;  %576 = vmatmul.bf16.gmra.mxu1 %v972_v33 }
  0x8c   : > { %616 = vmatmul.bf16.gmra.mxu2 %v980_v34  ;;  %656 = vmatmul.bf16.gmra.mxu3 %v988_v35 }
  0x9b   : > { %541 = vmatmul.bf16.gmra.mxu0 %v965_v36  ;;  %581 = vmatmul.bf16.gmra.mxu1 %v973_v37 }
  0x9c   : > { %621 = vmatmul.bf16.gmra.mxu2 %v981_v38  ;;  %661 = vmatmul.bf16.gmra.mxu3 %v989_v39 }
  0xa8   : > { %v507_v41 = vpop.f32.mrf.mxu0  ;;  %v547_v42 = vpop.f32.mrf.mxu1 }
  0xa9   : > { %v508_v43 = vadd.f32 %v1135_v40, %v507_v41  ;;  %v548_v44 = vadd.f32 %v1135_v40, %v547_v42 }
  0xab   : > { %667 = vst [vmem:[%s1140_s14] sm:$0xff] %v508_v43 }
  0xac   : > { %683 = vst [vmem:[%s1140_s14 + $0x80] sm:$0xff] %v548_v44 }
  0xaf   : > { %v587_v45 = vpop.f32.mrf.mxu2  ;;  %v627_v46 = vpop.f32.mrf.mxu3 }
  0xb0   : > { %v588_v47 = vadd.f32 %v1135_v40, %v587_v45  ;;  %v628_v48 = vadd.f32 %v1135_v40, %v627_v46  ;;  %v509_v49 = vpop.f32.mrf.mxu0  ;;  %v549_v50 = vpop.f32.mrf.mxu1 }
  0xb1   : > { %v510_v51 = vadd.f32 %v1135_v40, %v509_v49  ;;  %v550_v52 = vadd.f32 %v1135_v40, %v549_v50 }
  0xb2   : > { %699 = vst [vmem:[%s1140_s14 + $0x100] sm:$0xff] %v588_v47 }
  0xb3   : > { %715 = vst [vmem:[%s1140_s14 + $0x180] sm:$0xff] %v628_v48 }
  0xb4   : > { %668 = vst [vmem:[%s1140_s14 + $0x8] sm:$0xff] %v510_v51 }
  0xb5   : > { %684 = vst [vmem:[%s1140_s14 + $0x88] sm:$0xff] %v550_v52 }
  0xb7   : > { %v589_v53 = vpop.f32.mrf.mxu2  ;;  %v629_v54 = vpop.f32.mrf.mxu3 }
  0xb8   : > { %v590_v55 = vadd.f32 %v1135_v40, %v589_v53  ;;  %v630_v56 = vadd.f32 %v1135_v40, %v629_v54  ;;  %v512_v57 = vpop.f32.mrf.mxu0  ;;  %v552_v58 = vpop.f32.mrf.mxu1 }
  0xb9   : > { %v513_v59 = vadd.f32 %v1135_v40, %v512_v57  ;;  %v553_v60 = vadd.f32 %v1135_v40, %v552_v58 }
  0xba   : > { %700 = vst [vmem:[%s1140_s14 + $0x108] sm:$0xff] %v590_v55 }
  0xbb   : > { %716 = vst [vmem:[%s1140_s14 + $0x188] sm:$0xff] %v630_v56 }
  0xbc   : > { %669 = vst [vmem:[%s1140_s14 + $0x10] sm:$0xff] %v513_v59 }
  0xbd   : > { %685 = vst [vmem:[%s1140_s14 + $0x90] sm:$0xff] %v553_v60 }
  0xbf   : > { %v592_v61 = vpop.f32.mrf.mxu2  ;;  %v632_v62 = vpop.f32.mrf.mxu3 }
  0xc0   : > { %v593_v63 = vadd.f32 %v1135_v40, %v592_v61  ;;  %v633_v0 = vadd.f32 %v1135_v40, %v632_v62  ;;  %v514_v1 = vpop.f32.mrf.mxu0  ;;  %v554_v2 = vpop.f32.mrf.mxu1 }
  0xc1   : > { %v515_v3 = vadd.f32 %v1135_v40, %v514_v1  ;;  %v555_v4 = vadd.f32 %v1135_v40, %v554_v2 }
  0xc2   : > { %701 = vst [vmem:[%s1140_s14 + $0x110] sm:$0xff] %v593_v63 }
  0xc3   : > { %717 = vst [vmem:[%s1140_s14 + $0x190] sm:$0xff] %v633_v0 }
  0xc4   : > { %670 = vst [vmem:[%s1140_s14 + $0x18] sm:$0xff] %v515_v3 }
  0xc5   : > { %686 = vst [vmem:[%s1140_s14 + $0x98] sm:$0xff] %v555_v4 }
  0xc7   : > { %v594_v5 = vpop.f32.mrf.mxu2  ;;  %v634_v6 = vpop.f32.mrf.mxu3 }
  0xc8   : > { %v595_v7 = vadd.f32 %v1135_v40, %v594_v5  ;;  %v635_v8 = vadd.f32 %v1135_v40, %v634_v6  ;;  %v517_v9 = vpop.f32.mrf.mxu0  ;;  %v557_v10 = vpop.f32.mrf.mxu1 }
  0xc9   : > { %v518_v11 = vadd.f32 %v1135_v40, %v517_v9  ;;  %v558_v12 = vadd.f32 %v1135_v40, %v557_v10 }
  0xca   : > { %702 = vst [vmem:[%s1140_s14 + $0x118] sm:$0xff] %v595_v7 }
  0xcb   : > { %718 = vst [vmem:[%s1140_s14 + $0x198] sm:$0xff] %v635_v8 }
  0xcc   : > { %671 = vst [vmem:[%s1140_s14 + $0x20] sm:$0xff] %v518_v11 }
  0xcd   : > { %687 = vst [vmem:[%s1140_s14 + $0xa0] sm:$0xff] %v558_v12 }
  0xcf   : > { %v597_v13 = vpop.f32.mrf.mxu2  ;;  %v637_v14 = vpop.f32.mrf.mxu3 }
  0xd0   : > { %v598_v15 = vadd.f32 %v1135_v40, %v597_v13  ;;  %v638_v16 = vadd.f32 %v1135_v40, %v637_v14  ;;  %v519_v17 = vpop.f32.mrf.mxu0  ;;  %v559_v18 = vpop.f32.mrf.mxu1 }
  0xd1   : > { %v520_v19 = vadd.f32 %v1135_v40, %v519_v17  ;;  %v560_v20 = vadd.f32 %v1135_v40, %v559_v18 }
  0xd2   : > { %703 = vst [vmem:[%s1140_s14 + $0x120] sm:$0xff] %v598_v15 }
  0xd3   : > { %719 = vst [vmem:[%s1140_s14 + $0x1a0] sm:$0xff] %v638_v16 }
  0xd4   : > { %672 = vst [vmem:[%s1140_s14 + $0x28] sm:$0xff] %v520_v19 }
  0xd5   : > { %688 = vst [vmem:[%s1140_s14 + $0xa8] sm:$0xff] %v560_v20 }
  0xd7   : > { %v599_v21 = vpop.f32.mrf.mxu2  ;;  %v639_v22 = vpop.f32.mrf.mxu3 }
  0xd8   : > { %v600_v23 = vadd.f32 %v1135_v40, %v599_v21  ;;  %v640_v24 = vadd.f32 %v1135_v40, %v639_v22  ;;  %v522_v25 = vpop.f32.mrf.mxu0  ;;  %v562_v26 = vpop.f32.mrf.mxu1 }
  0xd9   : > { %v523_v27 = vadd.f32 %v1135_v40, %v522_v25  ;;  %v563_v28 = vadd.f32 %v1135_v40, %v562_v26 }
  0xda   : > { %704 = vst [vmem:[%s1140_s14 + $0x128] sm:$0xff] %v600_v23 }
  0xdb   : > { %720 = vst [vmem:[%s1140_s14 + $0x1a8] sm:$0xff] %v640_v24 }
  0xdc   : > { %673 = vst [vmem:[%s1140_s14 + $0x30] sm:$0xff] %v523_v27 }
  0xdd   : > { %689 = vst [vmem:[%s1140_s14 + $0xb0] sm:$0xff] %v563_v28 }
  0xdf   : > { %v602_v29 = vpop.f32.mrf.mxu2  ;;  %v642_v30 = vpop.f32.mrf.mxu3 }
  0xe0   : > { %v603_v31 = vadd.f32 %v1135_v40, %v602_v29  ;;  %v643_v32 = vadd.f32 %v1135_v40, %v642_v30  ;;  %v524_v33 = vpop.f32.mrf.mxu0  ;;  %v564_v34 = vpop.f32.mrf.mxu1 }
  0xe1   : > { %v525_v35 = vadd.f32 %v1135_v40, %v524_v33  ;;  %v565_v36 = vadd.f32 %v1135_v40, %v564_v34 }
  0xe2   : > { %705 = vst [vmem:[%s1140_s14 + $0x130] sm:$0xff] %v603_v31 }
  0xe3   : > { %721 = vst [vmem:[%s1140_s14 + $0x1b0] sm:$0xff] %v643_v32 }
  0xe4   : > { %674 = vst [vmem:[%s1140_s14 + $0x38] sm:$0xff] %v525_v35 }
  0xe5   : > { %690 = vst [vmem:[%s1140_s14 + $0xb8] sm:$0xff] %v565_v36 }
  0xe7   : > { %v604_v37 = vpop.f32.mrf.mxu2  ;;  %v644_v38 = vpop.f32.mrf.mxu3 }
  0xe8   : > { %v605_v39 = vadd.f32 %v1135_v40, %v604_v37  ;;  %v645_v41 = vadd.f32 %v1135_v40, %v644_v38  ;;  %v527_v42 = vpop.f32.mrf.mxu0  ;;  %v567_v43 = vpop.f32.mrf.mxu1 }
  0xe9   : > { %v528_v44 = vadd.f32 %v1135_v40, %v527_v42  ;;  %v568_v45 = vadd.f32 %v1135_v40, %v567_v43 }
  0xea   : > { %706 = vst [vmem:[%s1140_s14 + $0x138] sm:$0xff] %v605_v39 }
  0xeb   : > { %722 = vst [vmem:[%s1140_s14 + $0x1b8] sm:$0xff] %v645_v41 }
  0xec   : > { %675 = vst [vmem:[%s1140_s14 + $0x40] sm:$0xff] %v528_v44 }
  0xed   : > { %691 = vst [vmem:[%s1140_s14 + $0xc0] sm:$0xff] %v568_v45 }
  0xef   : > { %v607_v46 = vpop.f32.mrf.mxu2  ;;  %v647_v47 = vpop.f32.mrf.mxu3 }
  0xf0   : > { %v608_v48 = vadd.f32 %v1135_v40, %v607_v46  ;;  %v648_v49 = vadd.f32 %v1135_v40, %v647_v47  ;;  %v529_v50 = vpop.f32.mrf.mxu0  ;;  %v569_v51 = vpop.f32.mrf.mxu1 }
  0xf1   : > { %v530_v52 = vadd.f32 %v1135_v40, %v529_v50  ;;  %v570_v53 = vadd.f32 %v1135_v40, %v569_v51 }
  0xf2   : > { %707 = vst [vmem:[%s1140_s14 + $0x140] sm:$0xff] %v608_v48 }
  0xf3   : > { %723 = vst [vmem:[%s1140_s14 + $0x1c0] sm:$0xff] %v648_v49 }
  0xf4   : > { %676 = vst [vmem:[%s1140_s14 + $0x48] sm:$0xff] %v530_v52 }
  0xf5   : > { %692 = vst [vmem:[%s1140_s14 + $0xc8] sm:$0xff] %v570_v53 }
  0xf7   : > { %v609_v54 = vpop.f32.mrf.mxu2  ;;  %v649_v55 = vpop.f32.mrf.mxu3 }
  0xf8   : > { %v610_v56 = vadd.f32 %v1135_v40, %v609_v54  ;;  %v650_v57 = vadd.f32 %v1135_v40, %v649_v55  ;;  %v532_v58 = vpop.f32.mrf.mxu0  ;;  %v572_v59 = vpop.f32.mrf.mxu1 }
  0xf9   : > { %v533_v60 = vadd.f32 %v1135_v40, %v532_v58  ;;  %v573_v61 = vadd.f32 %v1135_v40, %v572_v59 }
  0xfa   : > { %708 = vst [vmem:[%s1140_s14 + $0x148] sm:$0xff] %v610_v56 }
  0xfb   : > { %724 = vst [vmem:[%s1140_s14 + $0x1c8] sm:$0xff] %v650_v57 }
  0xfc   : > { %677 = vst [vmem:[%s1140_s14 + $0x50] sm:$0xff] %v533_v60 }
  0xfd   : > { %693 = vst [vmem:[%s1140_s14 + $0xd0] sm:$0xff] %v573_v61 }
  0xff   : > { %v612_v62 = vpop.f32.mrf.mxu2  ;;  %v652_v63 = vpop.f32.mrf.mxu3 }
 0x100   : > { %v613_v0 = vadd.f32 %v1135_v40, %v612_v62  ;;  %v653_v1 = vadd.f32 %v1135_v40, %v652_v63  ;;  %v534_v2 = vpop.f32.mrf.mxu0  ;;  %v574_v3 = vpop.f32.mrf.mxu1 }
 0x101   : > { %v535_v4 = vadd.f32 %v1135_v40, %v534_v2  ;;  %v575_v5 = vadd.f32 %v1135_v40, %v574_v3 }
 0x102   : > { %709 = vst [vmem:[%s1140_s14 + $0x150] sm:$0xff] %v613_v0 }
 0x103   : > { %725 = vst [vmem:[%s1140_s14 + $0x1d0] sm:$0xff] %v653_v1 }
 0x104   : > { %678 = vst [vmem:[%s1140_s14 + $0x58] sm:$0xff] %v535_v4 }
 0x105   : > { %694 = vst [vmem:[%s1140_s14 + $0xd8] sm:$0xff] %v575_v5 }
 0x107   : > { %v614_v6 = vpop.f32.mrf.mxu2  ;;  %v654_v7 = vpop.f32.mrf.mxu3 }
 0x108   : > { %v615_v8 = vadd.f32 %v1135_v40, %v614_v6  ;;  %v655_v9 = vadd.f32 %v1135_v40, %v654_v7  ;;  %v537_v10 = vpop.f32.mrf.mxu0  ;;  %v577_v11 = vpop.f32.mrf.mxu1 }
 0x109   : > { %v538_v12 = vadd.f32 %v1135_v40, %v537_v10  ;;  %v578_v13 = vadd.f32 %v1135_v40, %v577_v11 }
 0x10a   : > { %710 = vst [vmem:[%s1140_s14 + $0x158] sm:$0xff] %v615_v8 }
 0x10b   : > { %726 = vst [vmem:[%s1140_s14 + $0x1d8] sm:$0xff] %v655_v9 }
 0x10c   : > { %679 = vst [vmem:[%s1140_s14 + $0x60] sm:$0xff] %v538_v12 }
 0x10d   : > { %695 = vst [vmem:[%s1140_s14 + $0xe0] sm:$0xff] %v578_v13 }
 0x10f   : > { %v617_v14 = vpop.f32.mrf.mxu2  ;;  %v657_v15 = vpop.f32.mrf.mxu3 }
 0x110   : > { %v618_v16 = vadd.f32 %v1135_v40, %v617_v14  ;;  %v658_v17 = vadd.f32 %v1135_v40, %v657_v15  ;;  %v539_v18 = vpop.f32.mrf.mxu0  ;;  %v579_v19 = vpop.f32.mrf.mxu1 }
 0x111   : > { %v540_v20 = vadd.f32 %v1135_v40, %v539_v18  ;;  %v580_v21 = vadd.f32 %v1135_v40, %v579_v19 }
 0x112   : > { %711 = vst [vmem:[%s1140_s14 + $0x160] sm:$0xff] %v618_v16 }
 0x113   : > { %727 = vst [vmem:[%s1140_s14 + $0x1e0] sm:$0xff] %v658_v17 }
 0x114   : > { %680 = vst [vmem:[%s1140_s14 + $0x68] sm:$0xff] %v540_v20 }
 0x115   : > { %696 = vst [vmem:[%s1140_s14 + $0xe8] sm:$0xff] %v580_v21 }
 0x117   : > { %v619_v22 = vpop.f32.mrf.mxu2  ;;  %v659_v23 = vpop.f32.mrf.mxu3 }
 0x118   : > { %v620_v24 = vadd.f32 %v1135_v40, %v619_v22  ;;  %v660_v25 = vadd.f32 %v1135_v40, %v659_v23  ;;  %v542_v26 = vpop.f32.mrf.mxu0  ;;  %v582_v27 = vpop.f32.mrf.mxu1 }
 0x119   : > { %v543_v28 = vadd.f32 %v1135_v40, %v542_v26  ;;  %v583_v29 = vadd.f32 %v1135_v40, %v582_v27 }
 0x11a   : > { %712 = vst [vmem:[%s1140_s14 + $0x168] sm:$0xff] %v620_v24 }
 0x11b   : > { %728 = vst [vmem:[%s1140_s14 + $0x1e8] sm:$0xff] %v660_v25 }
 0x11c   : > { %681 = vst [vmem:[%s1140_s14 + $0x70] sm:$0xff] %v543_v28 }
 0x11d   : > { %697 = vst [vmem:[%s1140_s14 + $0xf0] sm:$0xff] %v583_v29 }
 0x11f   : > { %v622_v30 = vpop.f32.mrf.mxu2  ;;  %v662_v31 = vpop.f32.mrf.mxu3 }
 0x120   : > { %v623_v32 = vadd.f32 %v1135_v40, %v622_v30  ;;  %v663_v33 = vadd.f32 %v1135_v40, %v662_v31  ;;  %v544_v34 = vpop.f32.mrf.mxu0  ;;  %v584_v35 = vpop.f32.mrf.mxu1 }
 0x121   : > { %v545_v36 = vadd.f32 %v1135_v40, %v544_v34  ;;  %v585_v37 = vadd.f32 %v1135_v40, %v584_v35 }
 0x122   : > { %713 = vst [vmem:[%s1140_s14 + $0x170] sm:$0xff] %v623_v32 }
 0x123   : > { %729 = vst [vmem:[%s1140_s14 + $0x1f0] sm:$0xff] %v663_v33 }
 0x124   : > { %682 = vst [vmem:[%s1140_s14 + $0x78] sm:$0xff] %v545_v36 }
 0x125   : > { %698 = vst [vmem:[%s1140_s14 + $0xf8] sm:$0xff] %v585_v37 }
 0x127   : > { %v624_v38 = vpop.f32.mrf.mxu2  ;;  %v664_v39 = vpop.f32.mrf.mxu3 }
 0x128   : > { %v625_v41 = vadd.f32 %v1135_v40, %v624_v38  ;;  %v665_v42 = vadd.f32 %v1135_v40, %v664_v39 }
 0x12a   : > { %714 = vst [vmem:[%s1140_s14 + $0x178] sm:$0xff] %v625_v41 }
 0x12b   : > { %730 = vst [vmem:[%s1140_s14 + $0x1f8] sm:$0xff] %v665_v42 }
 0x12c PF: > { %s13_s12 = sadd.s32 1, %s1037_s12  }
 0x12d   : > { %p10_p4 = scmp.ge.s32.totalorder %s13_s12, 4  }
 0x12f   :  { %12 = sbr.rel (!%p10_p4) target bundleno = 1 (0x1), region = 62 }

</bundles_post_ra>
